<compile_context>
chip_gen: v7x
topology: tpu7x:2x2x1
jax: 0.10.0
libtpu: 0.0.40
codegen_flags: <defaults>
</compile_context>

<pallas_src>
import numpy as np

import jax
import jax.numpy as jnp
from jax.experimental import pallas as pl
from jax.experimental.pallas import tpu as pltpu


def _round_up(x, m):
    return ((x + m - 1) // m) * m


def _cdiv(a, b):
    return -(-a // b)


def _vmem_budgets():
    """(vmem_limit_bytes, per-step tile budget) sized to the TPU generation.

    v5e/v6e (128 MiB physical): limit 96 MiB, tile budget 64 MiB.
    v7x (64 MiB per TensorCore) or unknown: limit 48 MiB, tile budget 32 MiB.
    """
    phys = 0
    try:
        phys = int(getattr(pltpu.get_tpu_info(), "vmem_capacity_bytes", 0) or 0)
    except Exception:
        phys = 0
    if phys <= 0:
        phys = 64 * 1024 * 1024  # conservative fallback: v7x per-TensorCore VMEM
    limit = max(32 * 1024 * 1024, min((phys * 3) // 4, 96 * 1024 * 1024))
    budget = max(24 * 1024 * 1024, min(phys // 2, 64 * 1024 * 1024))
    return limit, budget


_VMEM_LIMIT_BYTES, _VMEM_TILE_BUDGET = _vmem_budgets()


def _pick_block_cols(k4, c_in, in_bytes, weight_budget, requested=None):
    """Column (4*Cout) tile: full width unless the resident weight would blow the budget."""
    if requested is not None:
        tk4 = int(requested)
        assert k4 % tk4 == 0 and (tk4 == k4 or tk4 % 128 == 0), (k4, tk4)
        return tk4
    tk4 = k4
    if k4 % 128 != 0:          # small channel counts: weight is tiny, keep it whole
        return tk4
    while (tk4 > 128 and c_in * tk4 * in_bytes > weight_budget
           and (tk4 // 2) % 128 == 0 and k4 % (tk4 // 2) == 0):
        tk4 //= 2
    return tk4


def _pick_block_rows(n_rows, bytes_per_row, resident_bytes, budget, requested, default_rows):
    """Pixel-row tile (multiple of 8): as large as the VMEM budget comfortably allows."""
    if requested is not None:
        return max(8, _round_up(int(requested), 8))
    tn = max(8, _round_up(min(default_rows, n_rows), 8))
    if n_rows >= 16:
        # Guarantee >= 2 row-blocks so both v7x TensorCores get work on the "parallel" axis.
        tn = min(tn, max(8, _round_up((n_rows + 1) // 2, 8)))
    while tn > 8 and tn * bytes_per_row + resident_bytes > budget:
        tn = max(8, _round_up(tn // 2, 8))
    return tn


# ---------------------------------------------------------------------------
# Pass 1: conv-as-matmul recomputed in VMEM; emit per-block partial statistics
# accumulated about a per-column reference.  The conv output never touches HBM.
# ---------------------------------------------------------------------------
def _stats_kernel(x_ref, w_ref, ref_ref, sum_ref, sq_ref):
    y = jnp.dot(x_ref[...], w_ref[...], preferred_element_type=jnp.float32)
    d = y - ref_ref[...]
    tn, k4 = d.shape
    d3 = d.reshape(tn // 8, 8, k4)          # sublane-shaped partials: cheap vreg adds only
    sum_ref[...] = jnp.sum(d3, axis=0)
    sq_ref[...] = jnp.sum(d3 * d3, axis=0)


def _make_masked_stats_kernel(tn, n_valid):
    """Variant used only when the row tile does not divide N (ragged last block)."""
    def kernel(x_ref, w_ref, ref_ref, sum_ref, sq_ref):
        y = jnp.dot(x_ref[...], w_ref[...], preferred_element_type=jnp.float32)
        row = jax.lax.broadcasted_iota(jnp.int32, y.shape, 0) + pl.program_id(0) * tn
        d = jnp.where(row < n_valid, y - ref_ref[...], 0.0)   # zero out OOB (garbage) rows
        k4 = y.shape[1]
        d3 = d.reshape(tn // 8, 8, k4)
        sum_ref[...] = jnp.sum(d3, axis=0)
        sq_ref[...] = jnp.sum(d3 * d3, axis=0)
    return kernel


def _conv_stats(x2d, w2, ref_col, tn, tk4, vmem_limit):
    n, c = x2d.shape
    k4 = w2.shape[1]
    g_rows = _cdiv(n, tn)
    g_cols = k4 // tk4
    kernel = _stats_kernel if n % tn == 0 else _make_masked_stats_kernel(tn, n)
    return pl.pallas_call(
        kernel,
        out_shape=(
            jax.ShapeDtypeStruct((8 * g_rows, k4), jnp.float32),
            jax.ShapeDtypeStruct((8 * g_rows, k4), jnp.float32),
        ),
        grid_spec=pltpu.PrefetchScalarGridSpec(
            num_scalar_prefetch=0,
            grid=(g_rows, g_cols),
            in_specs=[
                pl.BlockSpec((tn, c), lambda i, j: (i, 0)),     # x resident across col steps
                pl.BlockSpec((c, tk4), lambda i, j: (0, j)),
                pl.BlockSpec((1, tk4), lambda i, j: (0, j)),
            ],
            out_specs=(
                pl.BlockSpec((8, tk4), lambda i, j: (i, j)),
                pl.BlockSpec((8, tk4), lambda i, j: (i, j)),
            ),
        ),
        compiler_params=pltpu.CompilerParams(
            dimension_semantics=("parallel", "parallel"),
            vmem_limit_bytes=vmem_limit,
        ),
    )(x2d, w2, ref_col)


# ---------------------------------------------------------------------------
# Pass 2: fused conv matmul + folded batch-norm affine + ReLU (single HBM write).
# Ragged last row-block needs no masking: out-of-bounds output rows are discarded.
# ---------------------------------------------------------------------------
def _fused_conv_bn_relu_kernel(x_ref, w_ref, scale_ref, shift_ref, o_ref):
    y = jnp.dot(x_ref[...], w_ref[...], preferred_element_type=jnp.float32)
    o_ref[...] = jnp.maximum(y * scale_ref[...] + shift_ref[...], 0.0).astype(o_ref.dtype)


def _conv_bn_relu(x2d, w2, scale_col, shift_col, tn, tk4, vmem_limit, out_dtype):
    n, c = x2d.shape
    k4 = w2.shape[1]
    g_rows = _cdiv(n, tn)
    g_cols = k4 // tk4
    return pl.pallas_call(
        _fused_conv_bn_relu_kernel,
        out_shape=jax.ShapeDtypeStruct((n, k4), out_dtype),
        grid_spec=pltpu.PrefetchScalarGridSpec(
            num_scalar_prefetch=0,
            grid=(g_rows, g_cols),
            in_specs=[
                pl.BlockSpec((tn, c), lambda i, j: (i, 0)),
                pl.BlockSpec((c, tk4), lambda i, j: (0, j)),
                pl.BlockSpec((1, tk4), lambda i, j: (0, j)),
                pl.BlockSpec((1, tk4), lambda i, j: (0, j)),
            ],
            out_specs=pl.BlockSpec((tn, tk4), lambda i, j: (i, j)),
        ),
        compiler_params=pltpu.CompilerParams(
            dimension_semantics=("parallel", "parallel"),
            vmem_limit_bytes=vmem_limit,
        ),
    )(x2d, w2, scale_col, shift_col)


# ---------------------------------------------------------------------------
# Full forward pass (matches the PyTorch module semantics, training-mode BN).
# ---------------------------------------------------------------------------
def upsample_forward(x, weight, bias, gamma, beta, eps=1e-5,
                     block_rows=None, block_rows_stats=None, block_cols=None,
                     matmul_dtype=jnp.float32, out_dtype=jnp.float32):
    # The ConvTranspose bias cancels exactly under training-mode BatchNorm (the per-channel
    # batch mean absorbs it), so it never enters the kernels.  Same module semantics.
    del bias

    B, T, H, W, C = x.shape
    Cout = weight.shape[1]
    K4 = 4 * Cout
    N = B * T * H * W

    in_bytes = np.dtype(matmul_dtype).itemsize
    out_bytes = np.dtype(out_dtype).itemsize

    # Channels-last pixel matrix (N, C): contiguous reshape, no pad / copy of x in XLA.
    x2d = x.reshape(N, C).astype(matmul_dtype)
    # weight (C_in, C_out, kH, kW) -> (C_in, kH, kW, C_out) -> (C_in, 4*C_out);
    # column index = (kh*2 + kw)*Cout + co.
    w2_f32 = jnp.transpose(weight, (0, 2, 3, 1)).reshape(C, K4).astype(jnp.float32)
    w2 = w2_f32.astype(matmul_dtype)

    # Cheap per-column reference (sample mean of x through the conv) to condition the
    # single-pass variance accumulation (avoids E[y^2] - mean^2 cancellation).
    samp = min(N, 4096)
    ref_c = x.reshape(N, C)[:samp].astype(jnp.float32).mean(axis=0) @ w2_f32   # (K4,)
    ref_col = ref_c.reshape(1, K4)

    # ---- tiling (generation-aware VMEM budgets) ----
    tk4 = _pick_block_cols(K4, C, in_bytes, _VMEM_TILE_BUDGET // 4, block_cols)
    g_cols = K4 // tk4
    w_bufs = 1 if g_cols == 1 else 2          # constant-index weight block stays resident
    resident = w_bufs * C * tk4 * in_bytes + 8 * K4 * 4 + 4 * 8 * tk4 * 4
    tn_stats = _pick_block_rows(N, 2 * C * in_bytes, resident,
                                _VMEM_TILE_BUDGET, block_rows_stats, 2048)
    tn_fused = _pick_block_rows(N, 2 * C * in_bytes + 2 * tk4 * out_bytes, resident,
                                _VMEM_TILE_BUDGET, block_rows, 1024)

    # ---- Pass 1: batch-norm batch statistics (reads x only). ----
    sum_parts, sq_parts = _conv_stats(x2d, w2, ref_col, tn_stats, tk4, _VMEM_LIMIT_BYTES)
    count = jnp.float32(N)                             # rows per (kh, kw, co) column
    sum_d = jnp.sum(sum_parts, axis=0)                 # (K4,) shifted sums
    sum_d2 = jnp.sum(sq_parts, axis=0)                 # (K4,) shifted sums of squares
    mu_col = ref_c + sum_d / count                     # per-column mean
    mean_c = mu_col.reshape(4, Cout).mean(axis=0)      # per-channel batch mean
    off = ref_c - jnp.tile(mean_c, 4)                  # column reference minus channel mean
    ssd_col = sum_d2 + 2.0 * off * sum_d + count * off * off   # sum_rows (y - mean_c)^2
    var_c = jnp.maximum(ssd_col.reshape(4, Cout).sum(axis=0) / (4.0 * count), 0.0)
    inv_std = jax.lax.rsqrt(var_c + eps)
    scale_c = gamma.astype(jnp.float32) * inv_std
    shift_c = beta.astype(jnp.float32) - mean_c * scale_c
    scale_col = jnp.tile(scale_c, 4).reshape(1, K4)
    shift_col = jnp.tile(shift_c, 4).reshape(1, K4)

    # ---- Pass 2: fused matmul + folded BN + ReLU; writes the activation once. ----
    o2d = _conv_bn_relu(x2d, w2, scale_col, shift_col, tn_fused, tk4,
                        _VMEM_LIMIT_BYTES, out_dtype)

    # NCHW assembly: out[bt, co, 2h+kh, 2w+kw], then PyTorch's *raw* reshape of that
    # contiguous buffer to (B, T, 2H, 2W, Cout)  (permute(0,1,2,3) is the identity).
    # TODO(synk): fold this interleave into the pass-2 out BlockSpec to kill the extra
    # read+write; use out_dtype=bfloat16 meanwhile to halve its traffic.
    o = o2d.reshape(B * T, H, W, 2, 2, Cout)
    o = jnp.transpose(o, (0, 5, 1, 3, 2, 4)).reshape(B * T, Cout, 2 * H, 2 * W)
    return o.reshape(B, T, 2 * H, 2 * W, Cout)


# ---------------------------------------------------------------------------
# Pure-JAX reference (mirrors the PyTorch module exactly, bias included).
# ---------------------------------------------------------------------------
def upsample_reference(x, weight, bias, gamma, beta, eps=1e-5):
    B, T, H, W, C = x.shape
    Cout = C // 2
    xn = jnp.transpose(x.reshape(B * T, H, W, C), (0, 3, 1, 2))   # NCHW
    t = jnp.einsum("nchw,cokl->nohkwl", xn, weight)               # (N, Cout, H, 2, W, 2)
    y = t.reshape(B * T, Cout, 2 * H, 2 * W) + bias[None, :, None, None]
    mean = y.mean(axis=(0, 2, 3), keepdims=True)
    var = ((y - mean) ** 2).mean(axis=(0, 2, 3), keepdims=True)
    y = (y - mean) / jnp.sqrt(var + eps)
    y = y * gamma[None, :, None, None] + beta[None, :, None, None]
    y = jnp.maximum(y, 0.0)
    return y.reshape(B, T, 2 * H, 2 * W, Cout)


def _make_inputs(B, T, H, W, C, seed=0):
    kx, kw, kb = jax.random.split(jax.random.PRNGKey(seed), 3)
    Cout = C // 2
    x = jax.random.normal(kx, (B, T, H, W, C), dtype=jnp.float32)
    weight = 0.1 * jax.random.normal(kw, (C, Cout, 2, 2), dtype=jnp.float32)
    bias = 0.1 * jax.random.normal(kb, (Cout,), dtype=jnp.float32)
    gamma = jnp.ones((Cout,), dtype=jnp.float32)   # BatchNorm2d default affine init
    beta = jnp.zeros((Cout,), dtype=jnp.float32)
    return x, weight, bias, gamma, beta


if __name__ == "__main__":
    fwd = jax.jit(upsample_forward,
                  static_argnames=("eps", "block_rows", "block_rows_stats",
                                   "block_cols", "matmul_dtype", "out_dtype"))

    # 1) f32, small tiles on a divisible N: exercises the multi-block row grid and the
    #    per-block partial-statistics reduction.
    B, T, H, W, C = 2, 2, 8, 8, 8
    x, weight, bias, gamma, beta = _make_inputs(B, T, H, W, C, seed=0)
    ref = upsample_reference(x, weight, bias, gamma, beta)
    out = jax.block_until_ready(fwd(x, weight, bias, gamma, beta,
                                    block_rows=64, block_rows_stats=64))
    assert out.shape == (B, T, 2 * H, 2 * W, C // 2), out.shape
    assert jnp.allclose(out, ref, rtol=1e-3, atol=1e-3), float(jnp.max(jnp.abs(out - ref)))

    # 2) Default (auto-tiled) f32 path.
    out2 = jax.block_until_ready(fwd(x, weight, bias, gamma, beta))
    assert jnp.allclose(out2, ref, rtol=1e-3, atol=1e-3), float(jnp.max(jnp.abs(out2 - ref)))

    # 3) bf16 matmul + bf16 output (v6e/v7x DMA-traffic mode), f32 accumulation/statistics.
    out_bf16 = jax.block_until_ready(
        fwd(x, weight, bias, gamma, beta,
            matmul_dtype=jnp.bfloat16, out_dtype=jnp.bfloat16))
    assert jnp.allclose(out_bf16.astype(jnp.float32), ref, rtol=1e-1, atol=1e-1), \
        float(jnp.max(jnp.abs(out_bf16.astype(jnp.float32) - ref)))

    # 4) Ragged pixel count (no XLA pad): masked stats tail + discarded OOB output rows.
    H2, W2 = 6, 6
    x3, _, _, _, _ = _make_inputs(B, T, H2, W2, C, seed=1)
    ref3 = upsample_reference(x3, weight, bias, gamma, beta)
    out3 = jax.block_until_ready(fwd(x3, weight, bias, gamma, beta,
                                     block_rows=64, block_rows_stats=64))
    assert out3.shape == (B, T, 2 * H2, 2 * W2, C // 2), out3.shape
    assert jnp.allclose(out3, ref3, rtol=1e-3, atol=1e-3), float(jnp.max(jnp.abs(out3 - ref3)))

    # 5) Wider layer with a forced K4 column grid axis (weight tiling path).
    C5 = 128
    x5, w5, b5, g5, be5 = _make_inputs(2, 2, 8, 8, C5, seed=2)
    ref5 = upsample_reference(x5, w5, b5, g5, be5)
    out5 = jax.block_until_ready(fwd(x5, w5, b5, g5, be5, block_rows=64, block_cols=128))
    assert out5.shape == ref5.shape, (out5.shape, ref5.shape)
    assert jnp.allclose(out5, ref5, rtol=1e-3, atol=1e-3), float(jnp.max(jnp.abs(out5 - ref5)))

    print("KERNEL_OK")
</pallas_src>

<mosaic_0001>
module attributes {stable_mosaic.version = 11 : i64} {
  func.func @_stats_kernel(%arg0: i32, %arg1: i32, %arg2: memref<64x8xf32, #tpu.memory_space<vmem>>, %arg3: memref<8x16xf32, #tpu.memory_space<vmem>>, %arg4: memref<1x16xf32, #tpu.memory_space<vmem>>, %arg5: memref<8x16xf32, #tpu.memory_space<vmem>>, %arg6: memref<8x16xf32, #tpu.memory_space<vmem>>) attributes {dimension_semantics = [#tpu.dimension_semantics<parallel>, #tpu.dimension_semantics<parallel>], iteration_bounds = array<i64: 4, 1>, scalar_prefetch = 0 : i64, scratch_operands = 0 : i64, tpu.core_type = #tpu.core_type<tc>, window_params = [{transform_indices = @transform_0, window_bounds = array<i64: 64, 8>}, {transform_indices = @transform_1, window_bounds = array<i64: 8, 16>}, {transform_indices = @transform_2, window_bounds = array<i64: 1, 16>}, {transform_indices = @transform_3, window_bounds = array<i64: 8, 16>}, {transform_indices = @transform_4, window_bounds = array<i64: 8, 16>}]} {
    %c0 = arith.constant 0 : index
    %c0_0 = arith.constant 0 : index
    %0 = vector.load %arg2[%c0, %c0_0] : memref<64x8xf32, #tpu.memory_space<vmem>>, vector<64x8xf32>
    %c0_1 = arith.constant 0 : index
    %c0_2 = arith.constant 0 : index
    %1 = vector.load %arg3[%c0_1, %c0_2] : memref<8x16xf32, #tpu.memory_space<vmem>>, vector<8x16xf32>
    %cst = arith.constant dense<0.000000e+00> : vector<64x16xf32>
    %2 = tpu.matmul %0, %1, %cst {dimension_numbers = #tpu.dot_dimension_numbers<[1], [0], [0], [1], [0, 0, 1, 1], [], []>} : vector<64x8xf32>, vector<8x16xf32>, vector<64x16xf32> -> vector<64x16xf32>
    %c0_3 = arith.constant 0 : index
    %c0_4 = arith.constant 0 : index
    %3 = vector.load %arg4[%c0_3, %c0_4] : memref<1x16xf32, #tpu.memory_space<vmem>>, vector<1x16xf32>
    %4 = vector.broadcast %3 : vector<1x16xf32> to vector<64x16xf32>
    %5 = arith.subf %2, %4 : vector<64x16xf32>
    %6 = vector.shape_cast %5 : vector<64x16xf32> to vector<8x8x16xf32>
    %cst_5 = arith.constant dense<0.000000e+00> : vector<8x16xf32>
    %7 = vector.multi_reduction <add>, %6, %cst_5 [0] : vector<8x8x16xf32> to vector<8x16xf32>
    %c0_6 = arith.constant 0 : index
    %c0_7 = arith.constant 0 : index
    %8 = vector.load %arg5[%c0_6, %c0_7] : memref<8x16xf32, #tpu.memory_space<vmem>>, vector<8x16xf32>
    tpu.vector_store %arg5[%c0_6, %c0_7], %7 {strides = array<i32>} : memref<8x16xf32, #tpu.memory_space<vmem>>, vector<8x16xf32>,
    %9 = arith.mulf %6, %6 : vector<8x8x16xf32>
    %cst_8 = arith.constant dense<0.000000e+00> : vector<8x16xf32>
    %10 = vector.multi_reduction <add>, %9, %cst_8 [0] : vector<8x8x16xf32> to vector<8x16xf32>
    %c0_9 = arith.constant 0 : index
    %c0_10 = arith.constant 0 : index
    %11 = vector.load %arg6[%c0_9, %c0_10] : memref<8x16xf32, #tpu.memory_space<vmem>>, vector<8x16xf32>
    tpu.vector_store %arg6[%c0_9, %c0_10], %10 {strides = array<i32>} : memref<8x16xf32, #tpu.memory_space<vmem>>, vector<8x16xf32>,
    return
  }
  func.func @transform_0(%arg0: i32, %arg1: i32) -> (i32, i32) {
    %c0_i32 = arith.constant 0 : i32
    %c0_i32_0 = arith.constant 0 : i32
    return %arg0, %c0_i32 : i32, i32
  }
  func.func @transform_1(%arg0: i32, %arg1: i32) -> (i32, i32) {
    %c0_i32 = arith.constant 0 : i32
    %c0_i32_0 = arith.constant 0 : i32
    return %c0_i32, %arg1 : i32, i32
  }
  func.func @transform_2(%arg0: i32, %arg1: i32) -> (i32, i32) {
    %c0_i32 = arith.constant 0 : i32
    %c0_i32_0 = arith.constant 0 : i32
    return %c0_i32, %arg1 : i32, i32
  }
  func.func @transform_3(%arg0: i32, %arg1: i32) -> (i32, i32) {
    %c0_i32 = arith.constant 0 : i32
    return %arg0, %arg1 : i32, i32
  }
  func.func @transform_4(%arg0: i32, %arg1: i32) -> (i32, i32) {
    %c0_i32 = arith.constant 0 : i32
    return %arg0, %arg1 : i32, i32
  }
}

module attributes {stable_mosaic.version = 11 : i64} {
  func.func @_fused_conv_bn_relu_kernel(%arg0: i32, %arg1: i32, %arg2: memref<64x8xf32, #tpu.memory_space<vmem>>, %arg3: memref<8x16xf32, #tpu.memory_space<vmem>>, %arg4: memref<1x16xf32, #tpu.memory_space<vmem>>, %arg5: memref<1x16xf32, #tpu.memory_space<vmem>>, %arg6: memref<64x16xf32, #tpu.memory_space<vmem>>) attributes {dimension_semantics = [#tpu.dimension_semantics<parallel>, #tpu.dimension_semantics<parallel>], iteration_bounds = array<i64: 4, 1>, scalar_prefetch = 0 : i64, scratch_operands = 0 : i64, tpu.core_type = #tpu.core_type<tc>, window_params = [{transform_indices = @transform_0, window_bounds = array<i64: 64, 8>}, {transform_indices = @transform_1, window_bounds = array<i64: 8, 16>}, {transform_indices = @transform_2, window_bounds = array<i64: 1, 16>}, {transform_indices = @transform_3, window_bounds = array<i64: 1, 16>}, {transform_indices = @transform_4, window_bounds = array<i64: 64, 16>}]} {
    %c0 = arith.constant 0 : index
    %c0_0 = arith.constant 0 : index
    %0 = vector.load %arg2[%c0, %c0_0] : memref<64x8xf32, #tpu.memory_space<vmem>>, vector<64x8xf32>
    %c0_1 = arith.constant 0 : index
    %c0_2 = arith.constant 0 : index
    %1 = vector.load %arg3[%c0_1, %c0_2] : memref<8x16xf32, #tpu.memory_space<vmem>>, vector<8x16xf32>
    %cst = arith.constant dense<0.000000e+00> : vector<64x16xf32>
    %2 = tpu.matmul %0, %1, %cst {dimension_numbers = #tpu.dot_dimension_numbers<[1], [0], [0], [1], [0, 0, 1, 1], [], []>} : vector<64x8xf32>, vector<8x16xf32>, vector<64x16xf32> -> vector<64x16xf32>
    %c0_3 = arith.constant 0 : index
    %c0_4 = arith.constant 0 : index
    %3 = vector.load %arg4[%c0_3, %c0_4] : memref<1x16xf32, #tpu.memory_space<vmem>>, vector<1x16xf32>
    %4 = vector.broadcast %3 : vector<1x16xf32> to vector<64x16xf32>
    %5 = arith.mulf %2, %4 : vector<64x16xf32>
    %c0_5 = arith.constant 0 : index
    %c0_6 = arith.constant 0 : index
    %6 = vector.load %arg5[%c0_5, %c0_6] : memref<1x16xf32, #tpu.memory_space<vmem>>, vector<1x16xf32>
    %7 = vector.broadcast %6 : vector<1x16xf32> to vector<64x16xf32>
    %8 = arith.addf %5, %7 : vector<64x16xf32>
    %cst_7 = arith.constant 0.000000e+00 : f32
    %9 = vector.broadcast %cst_7 : f32 to vector<64x16xf32>
    %10 = arith.maximumf %8, %9 : vector<64x16xf32>
    %c0_8 = arith.constant 0 : index
    %c0_9 = arith.constant 0 : index
    %11 = vector.load %arg6[%c0_8, %c0_9] : memref<64x16xf32, #tpu.memory_space<vmem>>, vector<64x16xf32>
    tpu.vector_store %arg6[%c0_8, %c0_9], %10 {strides = array<i32>} : memref<64x16xf32, #tpu.memory_space<vmem>>, vector<64x16xf32>,
    return
  }
  func.func @transform_0(%arg0: i32, %arg1: i32) -> (i32, i32) {
    %c0_i32 = arith.constant 0 : i32
    %c0_i32_0 = arith.constant 0 : i32
    return %arg0, %c0_i32 : i32, i32
  }
  func.func @transform_1(%arg0: i32, %arg1: i32) -> (i32, i32) {
    %c0_i32 = arith.constant 0 : i32
    %c0_i32_0 = arith.constant 0 : i32
    return %c0_i32, %arg1 : i32, i32
  }
  func.func @transform_2(%arg0: i32, %arg1: i32) -> (i32, i32) {
    %c0_i32 = arith.constant 0 : i32
    %c0_i32_0 = arith.constant 0 : i32
    return %c0_i32, %arg1 : i32, i32
  }
  func.func @transform_3(%arg0: i32, %arg1: i32) -> (i32, i32) {
    %c0_i32 = arith.constant 0 : i32
    %c0_i32_0 = arith.constant 0 : i32
    return %c0_i32, %arg1 : i32, i32
  }
  func.func @transform_4(%arg0: i32, %arg1: i32) -> (i32, i32) {
    %c0_i32 = arith.constant 0 : i32
    return %arg0, %arg1 : i32, i32
  }
}

</mosaic_0001>

<bundles_post_ra>
// kernel: tile.28
= control target key start
LH: loop header
LB: loop body
LE: loop exit
PB: predicated region body
PF: predicated region fallthrough
CT: control target
= control target key end

     0   :  { %s22_s0 = inlined_call_operand.vmem [shape: f32[4], index: 0, kind: input, shape index: {}]   ;;  %s23_s1 = inlined_call_operand.vmem [shape: f32[4,4], index: 1, kind: output, shape index: {}]  }
   0x1   :  { %v4_v0 = vld [vmem:[%s22_s0] ss:$0 sm:$0xff] }
   0x2   :  { %5 = vst [vmem:[%s23_s1] sm:$0xf] %v4_v0 }

// kernel: tile.29
= control target key start
LH: loop header
LB: loop body
LE: loop exit
PB: predicated region body
PF: predicated region fallthrough
CT: control target
= control target key end

     0   :  { %vm7_vm0 = vcmask 31744   ;;  %s37_s8 = smov 4   ;;  %s38_s9 = smov 8   ;;  %vm13_vm1 = vcmask 130144   ;;  %vm19_vm2 = vcmask 97344   ;;  %vm25_vm3 = vcmask 64544   ;;  %s55_s0 = inlined_call_operand.vmem [shape: f32[4,4], index: 0, kind: input, shape index: {}]   ;;  %s56_s1 = inlined_call_operand.vmem [shape: f32[1,16], index: 1, kind: output, shape index: {}]  }
   0x1   :  { %v4_v0 = vld [vmem:[%s55_s0] sm:$0xf]  ;;  %s36_s0 = smov 12  }
   0x2   :  { %5 = vst [vmem:[#allocation1] sm:$0xf] %v4_v0 }
   0x9   :  { %v10_v1 = vld [vmem:[#allocation1 + $0x3] sm:$0x1]   ;;  %v22_v2 = vld [vmem:[#allocation1 + $0x1] sm:$0x1]   ;;  %v6_v3 = vld [vmem:[#allocation1] sm:$0x1]  }
   0xa   :  { %11 = vrot.lane.b32.xlu0 %v10_v1, %s36_s0  ;;  %23 = vrot.lane.b32.xlu1 %v22_v2, %s37_s8  ;;  %v16_v4 = vld [vmem:[#allocation1 + $0x2] sm:$0x1]   ;;  %8 = vst.msk [vmem:[#allocation0] sm:$0x1] %vm7_vm0, %v6_v3  }
   0xe   :  { %17 = vrot.lane.b32.xlu0 %v16_v4, %s38_s9 }
  0x7c   :  { %v12_v5 = vpop.permute.xlu0 %11   ;;  %v24_v6 = vpop.permute.xlu1 %23  }
  0x7d   :  { %14 = vst.msk [vmem:[#allocation0] sm:$0x1] %vm13_vm1, %v12_v5  }
  0x80   :  { %v18_v7 = vpop.permute.xlu0 %17  }
  0x81   :  { %20 = vst.msk [vmem:[#allocation0] sm:$0x1] %vm19_vm2, %v18_v7  }
  0x82   :  { %26 = vst.msk [vmem:[#allocation0] sm:$0x1] %vm25_vm3, %v24_v6  }
  0x89   :  { %v30_v8 = vld [vmem:[#allocation0] sm:$0x1] }
  0x8a   :  { %32 = vst [vmem:[%s56_s1] sm:$0x1] %v30_v8 }

// kernel: upsample_forward.2
= control target key start
LH: loop header
LB: loop body
LE: loop exit
PB: predicated region body
PF: predicated region fallthrough
CT: control target
= control target key end

     0   :  { %s723_s15 = smov 0   ;;  %s725_s16 = smov 0   ;;  %s796_s0 = inlined_call_operand.vmem [shape: f32[256,8], index: 0, kind: input, shape index: {}]   ;;  %s797_s1 = inlined_call_operand.vmem [shape: f32[8,16], index: 1, kind: input, shape index: {}]   ;;  %s798_s2 = inlined_call_operand.vmem [shape: f32[1,16], index: 2, kind: input, shape index: {}]   ;;  %s799_s3 = inlined_call_operand.vmem [shape: f32[32,16], index: 3, kind: output, shape index: {0}]   ;;  %s800_s4 = inlined_call_operand.vmem [shape: f32[32,16], index: 4, kind: output, shape index: {1}]  }
   0x1   :  { %s727_s17 = smov 0  }
   0x2 LB: > { %s27_s18 = sadd.s32 1, %s692_s16  ;;  %p609_p0 = scmp.ge.s32.totalorder %s696_s17, 1  ;;  %s696_s17 = sphi %s727_s17, %s15_s17   ;;  %s692_s16 = sphi %s725_s16, %s802_s16   ;;  %s688_s15 = sphi %s723_s15, %s801_s15  }
   0x3   : > { %p29_p1 = scmp.ge.s32.totalorder %s27_s18, 4  ;;  %p199_p2 = scmp.lt.s32.totalorder %s696_s17, 5 }
   0x5   : > { %s804_s18 = smov (%p29_p1, %s27_s18), 0  ;;  %p200_p3 = pnand %p609_p0, %p199_p2 }
   0x6   : > { %v276_v0 = vld [vmem:[%s797_s1] sm:$0xff] (!%p200_p3)  ;;  %s610_s21 = sshll.u32 (!%p200_p3), %s688_s15, 3  ;;  %vm277_vm0 = vcmask (!%p200_p3), 64512   ;;  %vm422_vm1 = vcmask (!%p200_p3), 130048   ;;  %p254_p5 = scmp.lt.s32.totalorder (!%p200_p3), %s688_s15, 3 }
   0x7   : > { %203 = sbr.rel (%p200_p3) target bundleno = 254 (0xfe), region = 32  ;;  %634 = vmatprep.subr.mxu0 (!%p200_p3), %v276_v0  ;;  %p242_p4 = scmp.lt.s32.totalorder (!%p200_p3), %s610_s21, 31  ;;  %648 = vmatprep.subr.mxu1 (!%p200_p3), %v276_v0  ;;  %v622_v9 = vld [vmem:[%s798_s2] ss:$0 sm:$0xff] (!%p200_p3) }
   0x8   : > { %635 = vmatpush3.msra.mxu0 (!%p200_p3), %v276_v0  ;;  %649 = vmatpush3.msra.mxu1 (!%p200_p3), %v276_v0 }
   0xe   : > { %s806_s21 = smov (!%p242_p4, %s610_s21), 31  ;;  %s808_s15 = smov (!%p254_p5, %s688_s15), 3 }
   0xf   : > { %s611_s22 = sshll.u32 %s806_s21, 3  ;;  %s612_s28 = sshll.u32 %s808_s15, 3 }
  0x10   : > { %s245_s25 = scalar_lea.vmem %s796_s0, %s611_s22  ;;  %s260_s5 = scalar_lea.vmem %s799_s3, %s612_s28 }
  0x11   : > { %v268_v1 = vld [vmem:[%s245_s25] sm:$0xff]  ;;  %v269_v2 = vld [vmem:[%s245_s25 + $0x8] sm:$0xff]  ;;  %v270_v3 = vld [vmem:[%s245_s25 + $0x10] sm:$0xff]  ;;  %s267_s8 = scalar_lea.vmem %s800_s4, %s612_s28 }
  0x12   : > { %636 = vmatprep.mubr.msk.f32.mxu0 %vm277_vm0, %v268_v1  ;;  %v272_v4 = vld [vmem:[%s245_s25 + $0x20] sm:$0xff]  ;;  %v273_v5 = vld [vmem:[%s245_s25 + $0x28] sm:$0xff]  ;;  %v274_v6 = vld [vmem:[%s245_s25 + $0x30] sm:$0xff] }
  0x13   : > { %637 = vmatmul.mubr.msk.f32.vlgmr.msra.gmra.mrb[0].mxu0 %vm277_vm0, %v269_v2  ;;  %642 = vmatprep.mubr.msk.f32.mxu1 %vm277_vm0, %v272_v4  ;;  %v271_v7 = vld [vmem:[%s245_s25 + $0x18] sm:$0xff] }
  0x14   : > { %639 = vmatprep.mubr.msk.f32.mxu0 %vm277_vm0, %v270_v3  ;;  %643 = vmatmul.mubr.msk.f32.vlgmr.msra.gmra.mrb[0].mxu1 %vm277_vm0, %v273_v5  ;;  %v275_v8 = vld [vmem:[%s245_s25 + $0x38] sm:$0xff] }
  0x15   : > { %645 = vmatprep.mubr.msk.f32.mxu1 %vm277_vm0, %v274_v6 }
  0x17   : > { %640 = vmatmul.mubr.msk.f32.gmra.mrb[2].mxu0 %vm277_vm0, %v271_v7 }
  0x18   : > { %646 = vmatmul.mubr.msk.f32.gmra.mrb[2].mxu1 %vm277_vm0, %v275_v8 }
  0xe6   : > { %v638_v10 = vpop.f32.mrb[0].mxu0 }
  0xe7   : > { %v415_v11 = vsub.f32 %v638_v10, %v622_v9  ;;  %v368_v12 = vpop.f32.mrb[1].mxu0  ;;  %v644_v13 = vpop.f32.mrb[0].mxu1 }
  0xe8   : > { %v414_v14 = vsub.f32 %v368_v12, %v622_v9  ;;  %v388_v15 = vpop.f32.mrb[1].mxu1  ;;  %v419_v31 = vsub.f32 %v644_v13, %v622_v9 }
  0xe9   : > { %v424_v16 = vsel %vm422_vm1, %v415_v11, 0.0  ;;  %v440_v17 = vmul.f32 %v415_v11, %v415_v11  ;;  %v418_v18 = vsub.f32 %v388_v15, %v622_v9 }
  0xea   : > { %v423_v19 = vsel %vm422_vm1, %v414_v14, 0.0  ;;  %v439_v20 = vmul.f32 %v414_v14, %v414_v14  ;;  %v641_v21 = vpop.f32.mrb[2].mxu0  ;;  %v444_v42 = vmul.f32 %v419_v31, %v419_v31  ;;  %v432_v50 = vsel %vm422_vm1, %v419_v31, 0.0 }
  0xeb   : > { %v448_v22 = vsel %vm422_vm1, %v440_v17, 0.0  ;;  %v425_v23 = vadd.f32 %v424_v16, %v423_v19  ;;  %v417_v24 = vsub.f32 %v641_v21, %v622_v9  ;;  %v378_v25 = vpop.f32.mrb[3].mxu0  ;;  %v647_v26 = vpop.f32.mrb[2].mxu1  ;;  %v443_v32 = vmul.f32 %v418_v18, %v418_v18 }
  0xec   : > { %v447_v27 = vsel %vm422_vm1, %v439_v20, 0.0  ;;  %v416_v28 = vsub.f32 %v378_v25, %v622_v9  ;;  %v398_v29 = vpop.f32.mrb[3].mxu1  ;;  %v430_v40 = vsel %vm422_vm1, %v418_v18, 0.0  ;;  %v421_v46 = vsub.f32 %v647_v26, %v622_v9 }
  0xed   : > { %v449_v30 = vadd.f32 %v448_v22, %v447_v27  ;;  %v442_v33 = vmul.f32 %v417_v24, %v417_v24  ;;  %v420_v36 = vsub.f32 %v398_v29, %v622_v9  ;;  %v428_v38 = vsel %vm422_vm1, %v417_v24, 0.0 }
  0xee   : > { %v426_v34 = vsel %vm422_vm1, %v416_v28, 0.0  ;;  %v441_v35 = vmul.f32 %v416_v28, %v416_v28  ;;  %v454_v45 = vsel %vm422_vm1, %v443_v32, 0.0  ;;  %v456_v54 = vsel %vm422_vm1, %v444_v42, 0.0 }
  0xef   : > { %v427_v37 = vadd.f32 %v426_v34, %v425_v23  ;;  %v452_v44 = vsel %vm422_vm1, %v442_v33, 0.0  ;;  %v445_v47 = vmul.f32 %v420_v36, %v420_v36  ;;  %v434_v51 = vsel %vm422_vm1, %v420_v36, 0.0 }
  0xf0   : > { %v450_v39 = vsel %vm422_vm1, %v441_v35, 0.0  ;;  %v446_v55 = vmul.f32 %v421_v46, %v421_v46  ;;  %v436_v59 = vsel %vm422_vm1, %v421_v46, 0.0 }
  0xf1   : > { %v451_v41 = vadd.f32 %v450_v39, %v449_v30  ;;  %v429_v43 = vadd.f32 %v428_v38, %v427_v37  ;;  %v458_v56 = vsel %vm422_vm1, %v445_v47, 0.0 }
  0xf2   : > { %v460_v62 = vsel %vm422_vm1, %v446_v55, 0.0 }
  0xf3   : > { %v431_v48 = vadd.f32 %v430_v40, %v429_v43  ;;  %v453_v49 = vadd.f32 %v452_v44, %v451_v41 }
  0xf5   : > { %v455_v52 = vadd.f32 %v454_v45, %v453_v49  ;;  %v433_v53 = vadd.f32 %v432_v50, %v431_v48 }
  0xf7   : > { %v435_v57 = vadd.f32 %v434_v51, %v433_v53  ;;  %v457_v58 = vadd.f32 %v456_v54, %v455_v52 }
  0xf9   : > { %v437_v60 = vadd.f32 %v436_v59, %v435_v57  ;;  %v459_v61 = vadd.f32 %v458_v56, %v457_v58 }
  0xfb   : > { %438 = vst.msk [vmem:[%s260_s5] sm:$0xff] %vm422_vm1, %v437_v60  ;;  %v461_v63 = vadd.f32 %v460_v62, %v459_v61 }
  0xfd   : > { %462 = vst.msk [vmem:[%s267_s8] sm:$0xff] %vm422_vm1, %v461_v63 }
  0xfe PF: > { %s15_s17 = sadd.s32 1, %s696_s17   ;;  %s801_s15 = smov %s692_s16 }
  0xff   : > { %p12_p6 = scmp.ge.s32.totalorder %s15_s17, 6   ;;  %s802_s16 = smov %s804_s18 }
 0x101   :  { %14 = sbr.rel (!%p12_p6) target bundleno = 2 (0x2), region = 80 }

// kernel: upsample_forward.3
= control target key start
LH: loop header
LB: loop body
LE: loop exit
PB: predicated region body
PF: predicated region fallthrough
CT: control target
= control target key end

     0   :  { %s688_s15 = smov 0   ;;  %s690_s16 = smov 0   ;;  %s763_s0 = inlined_call_operand.vmem [shape: f32[256,8], index: 0, kind: input, shape index: {}]   ;;  %s764_s1 = inlined_call_operand.vmem [shape: f32[8,16], index: 1, kind: input, shape index: {}]   ;;  %s765_s2 = inlined_call_operand.vmem [shape: f32[1,16], index: 2, kind: input, shape index: {}]   ;;  %s766_s3 = inlined_call_operand.vmem [shape: f32[1,16], index: 3, kind: input, shape index: {}]   ;;  %s767_s4 = inlined_call_operand.vmem [shape: f32[256,16], index: 4, kind: output, shape index: {}]  }
   0x1   :  { %s692_s17 = smov 0  }
   0x2 LB: > { %s26_s18 = sadd.s32 1, %s657_s16  ;;  %p573_p0 = scmp.ge.s32.totalorder %s661_s17, 1  ;;  %s661_s17 = sphi %s692_s17, %s14_s17   ;;  %s657_s16 = sphi %s690_s16, %s769_s16   ;;  %s653_s15 = sphi %s688_s15, %s768_s15  }
   0x3   : > { %p28_p1 = scmp.ge.s32.totalorder %s26_s18, 4  ;;  %p202_p2 = scmp.lt.s32.totalorder %s661_s17, 5 }
   0x5   : > { %s771_s18 = smov (%p28_p1, %s26_s18), 0  ;;  %p203_p3 = pnand %p573_p0, %p202_p2 }
   0x6   : > { %v274_v0 = vld [vmem:[%s764_s1] sm:$0xff] (!%p203_p3)  ;;  %s574_s21 = sshll.u32 (!%p203_p3), %s653_s15, 3  ;;  %vm275_vm0 = vcmask (!%p203_p3), 64512   ;;  %vm443_vm1 = vcmask (!%p203_p3), 130048  }
   0x7   : > { %206 = sbr.rel (%p203_p3) target bundleno = 244 (0xf4), region = 36  ;;  %599 = vmatprep.subr.mxu0 (!%p203_p3), %v274_v0  ;;  %613 = vmatprep.subr.mxu1 (!%p203_p3), %v274_v0  ;;  %p242_p4 = scmp.lt.s32.totalorder (!%p203_p3), %s574_s21, 31  ;;  %v586_v9 = vld [vmem:[%s765_s2] ss:$0 sm:$0xff] (!%p203_p3) }
   0x8   : > { %600 = vmatpush3.msra.mxu0 (!%p203_p3), %v274_v0  ;;  %614 = vmatpush3.msra.mxu1 (!%p203_p3), %v274_v0  ;;  %v587_v11 = vld [vmem:[%s766_s3] ss:$0 sm:$0xff] (!%p203_p3) }
   0xe   : > { %s773_s21 = smov (!%p242_p4, %s574_s21), 31 }
   0xf   : > { %s575_s22 = sshll.u32 %s773_s21, 3 }
  0x10   : > { %s245_s25 = scalar_lea.vmem %s763_s0, %s575_s22  ;;  %s736_s6 = scalar_lea.vmem %s767_s4, %s575_s22 }
  0x11   : > { %v266_v1 = vld [vmem:[%s245_s25] sm:$0xff]  ;;  %v267_v3 = vld [vmem:[%s245_s25 + $0x8] sm:$0xff]  ;;  %v268_v5 = vld [vmem:[%s245_s25 + $0x10] sm:$0xff] }
  0x12   : > { %v270_v2 = vld [vmem:[%s245_s25 + $0x20] sm:$0xff]  ;;  %601 = vmatprep.mubr.msk.f32.mxu0 %vm275_vm0, %v266_v1  ;;  %v271_v4 = vld [vmem:[%s245_s25 + $0x28] sm:$0xff]  ;;  %v272_v6 = vld [vmem:[%s245_s25 + $0x30] sm:$0xff] }
  0x13   : > { %607 = vmatprep.mubr.msk.f32.mxu1 %vm275_vm0, %v270_v2  ;;  %602 = vmatmul.mubr.msk.f32.vlgmr.msra.gmra.mrb[0].mxu0 %vm275_vm0, %v267_v3  ;;  %v269_v7 = vld [vmem:[%s245_s25 + $0x18] sm:$0xff] }
  0x14   : > { %608 = vmatmul.mubr.msk.f32.vlgmr.msra.gmra.mrb[0].mxu1 %vm275_vm0, %v271_v4  ;;  %604 = vmatprep.mubr.msk.f32.mxu0 %vm275_vm0, %v268_v5  ;;  %v273_v8 = vld [vmem:[%s245_s25 + $0x38] sm:$0xff] }
  0x15   : > { %610 = vmatprep.mubr.msk.f32.mxu1 %vm275_vm0, %v272_v6 }
  0x17   : > { %605 = vmatmul.mubr.msk.f32.gmra.mrb[2].mxu0 %vm275_vm0, %v269_v7 }
  0x18   : > { %611 = vmatmul.mubr.msk.f32.gmra.mrb[2].mxu1 %vm275_vm0, %v273_v8 }
  0xe6   : > { %v603_v10 = vpop.f32.mrb[0].mxu0 }
  0xe7   : > { %v609_v12 = vpop.f32.mrb[0].mxu1  ;;  %v413_v13 = vmul.f32 %v603_v10, %v586_v9  ;;  %v366_v15 = vpop.f32.mrb[1].mxu0 }
  0xe8   : > { %v417_v14 = vmul.f32 %v609_v12, %v586_v9  ;;  %v386_v16 = vpop.f32.mrb[1].mxu1  ;;  %v412_v17 = vmul.f32 %v586_v9, %v366_v15 }
  0xe9   : > { %v416_v18 = vmul.f32 %v586_v9, %v386_v16  ;;  %v428_v19 = vadd.f32 %v587_v11, %v413_v13 }
  0xea   : > { %v432_v20 = vadd.f32 %v587_v11, %v417_v14  ;;  %v427_v21 = vadd.f32 %v587_v11, %v412_v17  ;;  %v606_v23 = vpop.f32.mrb[2].mxu0 }
  0xeb   : > { %v431_v22 = vadd.f32 %v587_v11, %v416_v18  ;;  %v612_v24 = vpop.f32.mrb[2].mxu1  ;;  %v436_v25 = vmax.f32 %v428_v19, 0.0  ;;  %v415_v27 = vmul.f32 %v606_v23, %v586_v9  ;;  %v376_v29 = vpop.f32.mrb[3].mxu0 }
  0xec   : > { %v440_v26 = vmax.f32 %v432_v20, 0.0  ;;  %v419_v28 = vmul.f32 %v612_v24, %v586_v9  ;;  %v396_v30 = vpop.f32.mrb[3].mxu1  ;;  %v435_v31 = vmax.f32 %v427_v21, 0.0  ;;  %v414_v33 = vmul.f32 %v586_v9, %v376_v29 }
  0xed   : > { %v439_v32 = vmax.f32 %v431_v22, 0.0  ;;  %v418_v34 = vmul.f32 %v586_v9, %v396_v30  ;;  %445 = vst.msk [vmem:[%s736_s6 + $0x8] sm:$0xff] %vm443_vm1, %v436_v25  ;;  %v430_v35 = vadd.f32 %v587_v11, %v415_v27 }
  0xee   : > { %449 = vst.msk [vmem:[%s736_s6 + $0x28] sm:$0xff] %vm443_vm1, %v440_v26  ;;  %v434_v36 = vadd.f32 %v587_v11, %v419_v28  ;;  %444 = vst.msk [vmem:[%s736_s6] sm:$0xff] %vm443_vm1, %v435_v31  ;;  %v429_v37 = vadd.f32 %v587_v11, %v414_v33 }
  0xef   : > { %448 = vst.msk [vmem:[%s736_s6 + $0x20] sm:$0xff] %vm443_vm1, %v439_v32  ;;  %v433_v38 = vadd.f32 %v587_v11, %v418_v34  ;;  %v438_v39 = vmax.f32 %v430_v35, 0.0 }
  0xf0   : > { %v442_v40 = vmax.f32 %v434_v36, 0.0  ;;  %v437_v41 = vmax.f32 %v429_v37, 0.0 }
  0xf1   : > { %v441_v42 = vmax.f32 %v433_v38, 0.0  ;;  %447 = vst.msk [vmem:[%s736_s6 + $0x18] sm:$0xff] %vm443_vm1, %v438_v39 }
  0xf2   : > { %451 = vst.msk [vmem:[%s736_s6 + $0x38] sm:$0xff] %vm443_vm1, %v442_v40  ;;  %446 = vst.msk [vmem:[%s736_s6 + $0x10] sm:$0xff] %vm443_vm1, %v437_v41 }
  0xf3   : > { %450 = vst.msk [vmem:[%s736_s6 + $0x30] sm:$0xff] %vm443_vm1, %v441_v42 }
  0xf4 PF: > { %s14_s17 = sadd.s32 1, %s661_s17   ;;  %s768_s15 = smov %s657_s16 }
  0xf5   : > { %p11_p5 = scmp.ge.s32.totalorder %s14_s17, 6   ;;  %s769_s16 = smov %s771_s18 }
  0xf7   :  { %13 = sbr.rel (!%p11_p5) target bundleno = 2 (0x2), region = 75 }

</bundles_post_ra>
